<compile_context>
chip_gen: v6e
topology: v6e:2x2x1
jax: 0.10.0
libtpu: 0.0.40
codegen_flags: <defaults>
</compile_context>

<pallas_src>
import jax
import jax.numpy as jnp
from jax.experimental import pallas as pl
from jax.experimental.pallas import tpu as pltpu


def _classifier_kernel(patches_ref, w_ref, b_ref, out_ref):
    # logits = patches @ w_eff + b   (MXU, f32 accumulation even for bf16 inputs)
    logits = jnp.dot(patches_ref[...], w_ref[...],
                     preferred_element_type=jnp.float32)
    logits = logits + b_ref[...]                               # (TL, C) f32

    # max softmax prob without materializing probs: max(softmax) = 1 / sum(exp(l - m))
    m = jnp.max(logits, axis=1, keepdims=True)                 # (TL, 1)
    s = jnp.sum(jnp.exp(logits - m), axis=1, keepdims=True)    # (TL, 1)
    max_prob = 1.0 / s                                         # exact divide (tiny)

    # argmax over classes on the logits (first index on ties, matching torch.max)
    n_cls = logits.shape[1]
    cls_iota = jax.lax.broadcasted_iota(jnp.int32, logits.shape, 1)
    cand = jnp.where(logits == m, cls_iota, n_cls)
    arg = jnp.min(cand, axis=1, keepdims=True).astype(jnp.float32)   # exact for C < 2**24

    # narrow output slab: lane 0 -> max prob, lane 1 -> argmax (as f32), lanes 2..7 -> 0
    lane = jax.lax.broadcasted_iota(jnp.int32, out_ref.shape, 1)      # (TL, 8)
    out_ref[...] = jnp.where(lane == 0, max_prob,
                             jnp.where(lane == 1, arg, 0.0))


def _fold_inputs(x, w, patch_hw, std, dtype):
    """Unfold x into (L, P) patches; fold the 3x channel repeat + 1/std into the weight."""
    pH, pW = patch_hw
    H, W = x.shape
    nH, nW = H // pH, W // pW
    P = pH * pW
    # cast BEFORE the relayout so the materialized patches round-trip is half width in bf16
    patches = (x.astype(dtype)
               .reshape(nH, pH, nW, pW).transpose(0, 2, 1, 3).reshape(nH * nW, P))
    w_eff = ((w[0:P] + w[P:2 * P] + w[2 * P:3 * P]) / std).astype(dtype)   # (P, C)
    return patches, w_eff


def _round_up(v, m):
    return ((v + m - 1) // m) * m


def run_normalized_model(x, w, b, patch_hw, std=255.0, *, tile_l=2048,
                         use_bf16=True, input_buffering=None):
    """x: (H, W) raw image; w: (3*pH*pW, C); b: (C,); std: normalization constant."""
    pH, pW = patch_hw
    H, W = x.shape
    nH, nW = H // pH, W // pW
    L = nH * nW
    P = pH * pW
    C = w.shape[1]

    dtype = jnp.bfloat16 if use_bf16 else jnp.float32
    patches, w_eff = _fold_inputs(x, w, patch_hw, std, dtype)
    b2 = b.reshape(1, C).astype(jnp.float32)          # bias added in f32 inside the kernel

    # L tiling: sublane alignment (16 for bf16 packing, 8 for f32), large tiles, and
    # >= 2 grid steps whenever L allows it so both v7x TensorCores get work.
    align = 16 if use_bf16 else 8
    TL = max(align, min(_round_up(tile_l, align), _round_up(L, align)))
    if TL >= L and L >= 2 * align:
        TL = _round_up(pl.cdiv(L, 2), align)
    L_pad = _round_up(L, TL)
    if L_pad != L:
        # zero padding rows produce logits == b; they are sliced off below
        patches = jnp.pad(patches, ((0, L_pad - L), (0, 0)))
    num_tiles = L_pad // TL

    patch_spec_kwargs = {}
    if input_buffering is not None:
        # deeper input buffering; only worth enabling if a profile shows exposed DMA
        patch_spec_kwargs["pipeline_mode"] = pl.Buffered(input_buffering)

    out = pl.pallas_call(
        _classifier_kernel,
        out_shape=jax.ShapeDtypeStruct((L_pad, 8), jnp.float32),
        grid=(num_tiles,),
        in_specs=[
            pl.BlockSpec((TL, P), lambda i: (i, 0), **patch_spec_kwargs),  # patch tile (pipelined)
            pl.BlockSpec((P, C), lambda i: (0, 0)),                        # folded weight, VMEM-resident
            pl.BlockSpec((1, C), lambda i: (0, 0)),                        # bias, VMEM-resident
        ],
        out_specs=pl.BlockSpec((TL, 8), lambda i: (i, 0)),
        compiler_params=pltpu.CompilerParams(
            dimension_semantics=("parallel",)),
    )(patches, w_eff, b2)

    max_values = out[:L, 0]                      # (L,) float32 max softmax prob
    max_indices = out[:L, 1].astype(jnp.int32)   # (L,) int32 argmax class
    # outcode = idx[0]*100 + idx[1]*10 + idx[2]
    outcode = max_indices[0] * 100 + max_indices[1] * 10 + max_indices[2]
    return outcode, max_values


def _reference(x, w, b, patch_hw, std):
    # Pure-JAX replica of the original torch forward (sanity check only).
    pH, pW = patch_hw
    H, W = x.shape
    nH, nW = H // pH, W // pW
    L = nH * nW
    xn = x / std
    patches = xn.reshape(nH, pH, nW, pW).transpose(0, 2, 1, 3).reshape(L, pH, pW)
    img = jnp.broadcast_to(patches[:, None, :, :], (L, 3, pH, pW)).reshape(L, -1)
    logits = img @ w + b
    probs = jax.nn.softmax(logits, axis=1)
    vals = probs.max(axis=1)
    idx = probs.argmax(axis=1)
    outcode = idx[0] * 100 + idx[1] * 10 + idx[2]
    return outcode, vals


if __name__ == "__main__":
    # A (16, 48) grayscale strip of three 16x16 digit patches
    # (the outcode uses the first 3 patch predictions).
    patch_hw = (16, 16)
    H, W = 16, 48
    NUM_CLASSES = 10
    D = 3 * patch_hw[0] * patch_hw[1]

    key = jax.random.PRNGKey(0)
    kx, kw, kb = jax.random.split(key, 3)

    x = jax.random.uniform(kx, (H, W), dtype=jnp.float32) * 255.0
    w = jax.random.normal(kw, (D, NUM_CLASSES), dtype=jnp.float32) * 0.02
    b = jax.random.normal(kb, (NUM_CLASSES,), dtype=jnp.float32) * 0.01

    ref_code, ref_vals = _reference(x, w, b, patch_hw, 255.0)

    # f32 path: strict check against the torch-faithful reference.
    code32, vals32 = run_normalized_model(x, w, b, patch_hw, std=255.0, use_bf16=False)
    jax.block_until_ready((code32, vals32))
    assert int(code32) == int(ref_code), (int(code32), int(ref_code))
    assert jnp.allclose(vals32, ref_vals, atol=1e-4, rtol=1e-4)

    # default (bf16) path: probs within bf16 tolerance; argmax checked against a
    # precision-matched (bf16-input, f32-accum) reference to avoid near-tie flips.
    code16, vals16 = run_normalized_model(x, w, b, patch_hw, std=255.0)
    jax.block_until_ready((code16, vals16))
    assert jnp.allclose(vals16, ref_vals, atol=1e-2, rtol=2e-2)

    p_bf, w_bf = _fold_inputs(x, w, patch_hw, 255.0, jnp.bfloat16)
    logits_bf = jnp.dot(p_bf, w_bf, preferred_element_type=jnp.float32) + b
    idx_bf = jnp.argmax(logits_bf, axis=1)
    ref_code_bf = int(idx_bf[0]) * 100 + int(idx_bf[1]) * 10 + int(idx_bf[2])
    assert int(code16) == ref_code_bf, (int(code16), ref_code_bf)

    print("KERNEL_OK")
</pallas_src>

<mosaic_0001>
module attributes {stable_mosaic.version = 11 : i64} {
  func.func @_classifier_kernel(%arg0: i32, %arg1: memref<8x256xf32, #tpu.memory_space<vmem>>, %arg2: memref<256x10xf32, #tpu.memory_space<vmem>>, %arg3: memref<1x10xf32, #tpu.memory_space<vmem>>, %arg4: memref<8x8xf32, #tpu.memory_space<vmem>>) attributes {dimension_semantics = [#tpu.dimension_semantics<parallel>], iteration_bounds = array<i64: 1>, scalar_prefetch = 0 : i64, scratch_operands = 0 : i64, tpu.core_type = #tpu.core_type<tc>, window_params = [{transform_indices = @transform_0, window_bounds = array<i64: 8, 256>}, {pipeline_mode = #tpu.pipeline_mode<synchronous>, transform_indices = @transform_1, window_bounds = array<i64: 256, 10>}, {pipeline_mode = #tpu.pipeline_mode<synchronous>, transform_indices = @transform_2, window_bounds = array<i64: 1, 10>}, {transform_indices = @transform_3, window_bounds = array<i64: 8, 8>}]} {
    %c0 = arith.constant 0 : index
    %c0_0 = arith.constant 0 : index
    %0 = vector.load %arg1[%c0, %c0_0] : memref<8x256xf32, #tpu.memory_space<vmem>>, vector<8x256xf32>
    %c0_1 = arith.constant 0 : index
    %c0_2 = arith.constant 0 : index
    %1 = vector.load %arg2[%c0_1, %c0_2] : memref<256x10xf32, #tpu.memory_space<vmem>>, vector<256x10xf32>
    %cst = arith.constant dense<0.000000e+00> : vector<8x10xf32>
    %2 = tpu.matmul %0, %1, %cst {dimension_numbers = #tpu.dot_dimension_numbers<[1], [0], [0], [1], [0, 0, 1, 1], [], []>} : vector<8x256xf32>, vector<256x10xf32>, vector<8x10xf32> -> vector<8x10xf32>
    %c0_3 = arith.constant 0 : index
    %c0_4 = arith.constant 0 : index
    %3 = vector.load %arg3[%c0_3, %c0_4] : memref<1x10xf32, #tpu.memory_space<vmem>>, vector<1x10xf32>
    %4 = vector.broadcast %3 : vector<1x10xf32> to vector<8x10xf32>
    %5 = arith.addf %2, %4 : vector<8x10xf32>
    %cst_5 = arith.constant dense<0xFF800000> : vector<8xf32>
    %6 = vector.multi_reduction <maximumf>, %5, %cst_5 [1] : vector<8x10xf32> to vector<8xf32>
    %7 = vector.shape_cast %6 : vector<8xf32> to vector<8x1xf32>
    %8 = vector.broadcast %7 : vector<8x1xf32> to vector<8x10xf32>
    %9 = arith.subf %5, %8 : vector<8x10xf32>
    %10 = math.exp %9 : vector<8x10xf32>
    %cst_6 = arith.constant dense<0.000000e+00> : vector<8xf32>
    %11 = vector.multi_reduction <add>, %10, %cst_6 [1] : vector<8x10xf32> to vector<8xf32>
    %12 = vector.shape_cast %11 : vector<8xf32> to vector<8x1xf32>
    %cst_7 = arith.constant 1.000000e+00 : f32
    %13 = vector.broadcast %cst_7 : f32 to vector<8x1xf32>
    %14 = arith.divf %13, %12 : vector<8x1xf32>
    %15 = tpu.iota {dimensions = array<i32: 1>} : vector<8x10xi32>
    %16 = vector.broadcast %7 : vector<8x1xf32> to vector<8x10xf32>
    %17 = arith.cmpf oeq, %5, %16 : vector<8x10xf32>
    %c10_i32 = arith.constant 10 : i32
    %18 = vector.broadcast %c10_i32 : i32 to vector<8x10xi32>
    %19 = arith.select %17, %15, %18 : vector<8x10xi1>, vector<8x10xi32>
    %cst_8 = arith.constant dense<2147483647> : vector<8xi32>
    %20 = vector.multi_reduction <minsi>, %19, %cst_8 [1] : vector<8x10xi32> to vector<8xi32>
    %21 = vector.shape_cast %20 : vector<8xi32> to vector<8x1xi32>
    %22 = arith.sitofp %21 : vector<8x1xi32> to vector<8x1xf32>
    %23 = tpu.iota {dimensions = array<i32: 1>} : vector<8x8xi32>
    %c0_i32 = arith.constant 0 : i32
    %24 = vector.broadcast %c0_i32 : i32 to vector<8x8xi32>
    %25 = arith.cmpi eq, %23, %24 : vector<8x8xi32>
    %c1_i32 = arith.constant 1 : i32
    %26 = vector.broadcast %c1_i32 : i32 to vector<8x8xi32>
    %27 = arith.cmpi eq, %23, %26 : vector<8x8xi32>
    %cst_9 = arith.constant 0.000000e+00 : f32
    %28 = vector.shape_cast %22 : vector<8x1xf32> to vector<8x1xf32>
    %29 = vector.broadcast %28 : vector<8x1xf32> to vector<8x8xf32>
    %30 = vector.broadcast %cst_9 : f32 to vector<8x8xf32>
    %31 = arith.select %27, %29, %30 : vector<8x8xi1>, vector<8x8xf32>
    %32 = vector.shape_cast %14 : vector<8x1xf32> to vector<8x1xf32>
    %33 = vector.broadcast %32 : vector<8x1xf32> to vector<8x8xf32>
    %34 = arith.select %25, %33, %31 : vector<8x8xi1>, vector<8x8xf32>
    %c0_10 = arith.constant 0 : index
    %c0_11 = arith.constant 0 : index
    %35 = vector.load %arg4[%c0_10, %c0_11] : memref<8x8xf32, #tpu.memory_space<vmem>>, vector<8x8xf32>
    tpu.vector_store %arg4[%c0_10, %c0_11], %34 {strides = array<i32>} : memref<8x8xf32, #tpu.memory_space<vmem>>, vector<8x8xf32>,
    return
  }
  func.func @transform_0(%arg0: i32) -> (i32, i32) {
    %c0_i32 = arith.constant 0 : i32
    %c0_i32_0 = arith.constant 0 : i32
    return %arg0, %c0_i32 : i32, i32
  }
  func.func @transform_1(%arg0: i32) -> (i32, i32) {
    %c0_i32 = arith.constant 0 : i32
    %c0_i32_0 = arith.constant 0 : i32
    %c0_i32_1 = arith.constant 0 : i32
    return %c0_i32, %c0_i32_0 : i32, i32
  }
  func.func @transform_2(%arg0: i32) -> (i32, i32) {
    %c0_i32 = arith.constant 0 : i32
    %c0_i32_0 = arith.constant 0 : i32
    %c0_i32_1 = arith.constant 0 : i32
    return %c0_i32, %c0_i32_0 : i32, i32
  }
  func.func @transform_3(%arg0: i32) -> (i32, i32) {
    %c0_i32 = arith.constant 0 : i32
    %c0_i32_0 = arith.constant 0 : i32
    return %arg0, %c0_i32 : i32, i32
  }
}

</mosaic_0001>

<bundles_post_ra>
// kernel: tpu_custom_call.1
= control target key start
LH: loop header
LB: loop body
LE: loop exit
PB: predicated region body
PF: predicated region fallthrough
CT: control target
= control target key end

     0   :  { %s373_s0 = inlined_call_operand.vmem [shape: f32[8,256], index: 0, kind: input, shape index: {}]   ;;  %s374_s1 = inlined_call_operand.vmem [shape: f32[256,10], index: 1, kind: input, shape index: {}]   ;;  %s375_s2 = inlined_call_operand.vmem [shape: f32[1,10], index: 2, kind: input, shape index: {}]   ;;  %s376_s3 = inlined_call_operand.hbm [shape: f32[8,8], index: 3, kind: output, shape index: {}]  }
   0x1   :  { %v48_v0 = vld [vmem:[%s374_s1 + $0xf8] sm:$0xff]  ;;  %v47_v2 = vld [vmem:[%s374_s1 + $0xf0] sm:$0xff]  ;;  %v46_v4 = vld [vmem:[%s374_s1 + $0xe8] sm:$0xff] }
   0x2   :  { %v32_v1 = vld [vmem:[%s374_s1 + $0x78] sm:$0xff]  ;;  %179 = vmatprep.subr.mxu0 %v48_v0  ;;  %v31_v3 = vld [vmem:[%s374_s1 + $0x70] sm:$0xff]  ;;  %v30_v5 = vld [vmem:[%s374_s1 + $0x68] sm:$0xff] }
   0x3   :  { %180 = vmatpush3.msra.mxu0 %v32_v1  ;;  %v45_v6 = vld [vmem:[%s374_s1 + $0xe0] sm:$0xff]  ;;  %v44_v8 = vld [vmem:[%s374_s1 + $0xd8] sm:$0xff]  ;;  %v43_v10 = vld [vmem:[%s374_s1 + $0xd0] sm:$0xff] }
   0x4   :  { %181 = vmatprep.subr.mxu0 %v47_v2  ;;  %v29_v7 = vld [vmem:[%s374_s1 + $0x60] sm:$0xff]  ;;  %v28_v9 = vld [vmem:[%s374_s1 + $0x58] sm:$0xff]  ;;  %v27_v11 = vld [vmem:[%s374_s1 + $0x50] sm:$0xff] }
   0x5   :  { %182 = vmatpush3.msra.mxu0 %v31_v3  ;;  %v42_v12 = vld [vmem:[%s374_s1 + $0xc8] sm:$0xff] }
   0x6   :  { %183 = vmatprep.subr.mxu0 %v46_v4  ;;  %v16_v13 = vld [vmem:[%s373_s0 + $0x8] sm:$0xff] }
   0x7   :  { %184 = vmatpush3.msra.mxu0 %v30_v5  ;;  %v26_v14 = vld [vmem:[%s374_s1 + $0x48] sm:$0xff]  ;;  %120 = vmatprep.mubr.f32.mxu0 %v16_v13 }
   0x8   :  { %185 = vmatprep.subr.mxu0 %v45_v6 }
   0x9   :  { %186 = vmatpush3.msra.mxu0 %v29_v7 }
   0xa   :  { %187 = vmatprep.subr.mxu0 %v44_v8 }
   0xb   :  { %188 = vmatpush3.msra.mxu0 %v28_v9 }
   0xc   :  { %189 = vmatprep.subr.mxu0 %v43_v10 }
   0xd   :  { %8 = vsyncpa [#allocation3], 0  ;;  %190 = vmatpush3.msra.mxu0 %v27_v11  ;;  %v41_v15 = vld [vmem:[%s374_s1 + $0xc0] sm:$0xff]  ;;  %v40_v17 = vld [vmem:[%s374_s1 + $0xb8] sm:$0xff]  ;;  %vm126_vm0 = vcmask 80896   ;;  %v138_v40 = vlaneseq  ;;  %vm162_vm5 = vcmask 64512  }
   0xe   :  { %191 = vmatprep.subr.mxu0 %v42_v12  ;;  %v25_v16 = vld [vmem:[%s374_s1 + $0x40] sm:$0xff]  ;;  %v24_v18 = vld [vmem:[%s374_s1 + $0x38] sm:$0xff]  ;;  %v39_v19 = vld [vmem:[%s374_s1 + $0xb0] sm:$0xff] }
   0xf   :  { %192 = vmatpush3.msra.mxu0 %v26_v14  ;;  %v23_v20 = vld [vmem:[%s374_s1 + $0x30] sm:$0xff]  ;;  %v38_v21 = vld [vmem:[%s374_s1 + $0xa8] sm:$0xff]  ;;  %v37_v23 = vld [vmem:[%s374_s1 + $0xa0] sm:$0xff]  ;;  %v139_v41 = vand.u32 127, %v138_v40 }
  0x10   :  { %193 = vmatprep.subr.mxu0 %v41_v15  ;;  %v22_v22 = vld [vmem:[%s374_s1 + $0x28] sm:$0xff]  ;;  %v21_v24 = vld [vmem:[%s374_s1 + $0x20] sm:$0xff]  ;;  %v36_v25 = vld [vmem:[%s374_s1 + $0x98] sm:$0xff] }
  0x11   :  { %194 = vmatpush3.msra.mxu0 %v25_v16  ;;  %v20_v26 = vld [vmem:[%s374_s1 + $0x18] sm:$0xff]  ;;  %v35_v27 = vld [vmem:[%s374_s1 + $0x90] sm:$0xff]  ;;  %v34_v29 = vld [vmem:[%s374_s1 + $0x88] sm:$0xff]  ;;  %vm159_vm3 = vcmp.eq.s32.totalorder %v139_v41, 1  ;;  %vm158_vm4 = vcmp.eq.s32.totalorder %v139_v41, 0 }
  0x12   :  { %195 = vmatprep.subr.mxu0 %v40_v17  ;;  %v19_v28 = vld [vmem:[%s374_s1 + $0x10] sm:$0xff]  ;;  %v18_v30 = vld [vmem:[%s374_s1 + $0x8] sm:$0xff]  ;;  %v33_v31 = vld [vmem:[%s374_s1 + $0x80] sm:$0xff] }
  0x13   :  { %196 = vmatpush3.msra.mxu0 %v24_v18  ;;  %v17_v32 = vld [vmem:[%s374_s1] sm:$0xff] }
  0x14   :  { %197 = vmatprep.subr.mxu0 %v39_v19  ;;  %v15_v33 = vld [vmem:[%s373_s0] sm:$0xff]  ;;  %s241_s0 = smov [#allocation2]  }
  0x15   :  { %198 = vmatpush3.msra.mxu0 %v23_v20  ;;  %v178_v35 = vld [vmem:[%s375_s2] ss:$0 sm:$0xff]  ;;  %s170_s1 = sshll.u32 %s241_s0, 4  ;;  %s171_s1 = int_to_ptr.vmem [resolvable:$true] %s170_s1 }
  0x16   :  { %199 = vmatprep.subr.mxu0 %v38_v21  ;;  %s219_s2 = scalar_lea.vmem %s171_s1, 128  ;;  %p224_p1 = scmp.lt.s32.totalorder %s171_s1, %s171_s1 }
  0x17   :  { %200 = vmatpush3.msra.mxu0 %v22_v22  ;;  %p220_p0 = scmp.ne.s32.totalorder %s171_s1, %s219_s2  ;;  %p225_p2 = scmp.lt.s32.totalorder %s219_s2, %s219_s2 }
  0x18   :  { %201 = vmatprep.subr.mxu0 %v37_v23 }
  0x19   :  { %202 = vmatpush3.msra.mxu0 %v21_v24  ;;  %p226_p3 = por %p225_p2, %p224_p1 }
  0x1a   :  { %203 = vmatprep.subr.mxu0 %v36_v25 }
  0x1b   :  { %204 = vmatpush3.msra.mxu0 %v20_v26  ;;  %p227_p4 = pnand %p226_p3, %p220_p0 }
  0x1c   :  { %205 = vmatprep.subr.mxu0 %v35_v27 }
  0x1d   :  { %206 = vmatpush3.msra.mxu0 %v19_v28 }
  0x1e   :  { %207 = vmatprep.subr.mxu0 %v34_v29 }
  0x1f   :  { %208 = vmatpush3.msra.mxu0 %v18_v30 }
  0x20   :  { %209 = vmatprep.subr.mxu0 %v33_v31 }
  0x21   :  { %210 = vmatpush3.msra.mxu0 %v17_v32 }
  0x22   :  { %121 = vmatmul.mubr.f32.vlgmr.msra.gmra.mxu0 %v15_v33 }
  0xe2   :  { %v211_v34 = vpop.f32.mrf.mxu0 }
  0xe4   :  { %v212_v36 = vpop.f32.mrf.mxu0 }
  0xe5   :  { %v213_v37 = vadd.f32 %v212_v36, %v211_v34 }
  0xe7   :  { %v123_v38 = vadd.f32 %v213_v37, %v178_v35 }
  0xe9   :  { %v127_v39 = vsel %vm126_vm0, %v123_v38, -inf }
  0xea   :  { %128 = vmax.xlane.f32.xlu0 %v127_v39 }
 0x173   :  { %v129_v42 = vpop.xlane.xlu0 %128 }
 0x174   :  { %v130_v43 = vsub.f32 %v123_v38, %v129_v42  ;;  %vm140_vm1 = vcmp.eq.f32.partialorder %v123_v38, %v129_v42 }
 0x175   :  { %v141_v44 = vsel %vm140_vm1, %v139_v41, 10 }
 0x176   :  { %v131_v45 = vmul.f32 1.442695, %v130_v43  ;;  %v142_v46 = vsel %vm126_vm0, %v141_v44, 2147483647 }
 0x177   :  { %v144_v47 = vshra.s32 %v142_v46, 16  ;;  %v143_v51 = vand.u32 65535, %v142_v46 }
 0x178   :  { %215 = vpow2.f32 %v131_v45 }
 0x179   :  { %v146_v48 = vcvt.s32.f32 %v144_v47  ;;  %v145_v53 = vcvt.s32.f32 %v143_v51 }
 0x17b   :  { %147 = vmin.xlane.f32.xlu0 %v146_v48 }
 0x185   :  { %v216_v49 = vpop.eup %215 }
 0x186   :  { %v133_v50 = vsel %vm126_vm0, %v216_v49, 0.0 }
 0x187   :  { %134 = vadd.xlane.f32.xlu1 %v133_v50 }
 0x204   :  { %v148_v52 = vpop.xlane.xlu0 %147 }
 0x205   :  { %vm149_vm2 = vcmp.eq.f32.partialorder %v146_v48, %v148_v52  ;;  %v154_v56 = vcvt.f32.s32 %v148_v52 }
 0x206   :  { %v150_v54 = vsel %vm149_vm2, %v145_v53, inf }
 0x207   :  { %151 = vmin.xlane.f32.xlu1 %v150_v54  ;;  %v155_v58 = vshll.u32 %v154_v56, 16 }
 0x210   :  { %v135_v55 = vpop.xlane.xlu1 %134 }
 0x211   :  { %217 = vrcp.f32 %v135_v55 }
 0x21e   :  { %v218_v62 = vpop.eup %217 }
 0x290   :  { %v152_v57 = vpop.xlane.xlu1 %151 }
 0x291   :  { %v153_v59 = vcvt.f32.s32 %v152_v57 }
 0x293   :  { %v156_v60 = vadd.s32 %v155_v58, %v153_v59 }
 0x295   :  { %v157_v61 = vcvt.s32.f32 %v156_v60 }
 0x297   :  { %v160_v63 = vsel %vm159_vm3, %v157_v61, 0.0 }
 0x298   :  { %v161_v0 = vsel %vm158_vm4, %v218_v62, %v160_v63 }
 0x299   :  { %163 = vst.msk [vmem:[#allocation2] sm:$0xff] %vm162_vm5, %v161_v0 }
 0x29a   :  { %230 = shalt.err (!%p227_p4)
}
 0x29b   :  { %173 = dma.vmem_to_hbm [thread:$0]  %s171_s1, 128, %s376_s3, [#allocation3]  }
 0x29c   :  { %239 = dma.done.wait [#allocation3], 128  }
 0x29d   :  { %240 = vsyncadd [#allocation3], 4294967168 }
 0x29e   :  { %177 = vsyncpa [#allocation3], 1 }

</bundles_post_ra>
